<compile_context>
chip_gen: v6e
topology: v6e:2x2x1
jax: 0.10.0
libtpu: 0.0.40
codegen_flags: <defaults>
</compile_context>

<pallas_src>
import functools
import math

import jax
import jax.numpy as jnp
import numpy as np
from jax.experimental import pallas as pl
from jax.experimental.pallas import tpu as pltpu

NEG_INF = -1e30
STAT_LANES = 128   # lane-replicated running-stat width (full unmasked vst)


def _resident_spec(block_shape, index_map):
    """BlockSpec for a weight that is resident across the whole grid.

    Constant index_map -> fetched once; request single buffering when the
    installed JAX exposes pipeline_mode (halves the weight VMEM footprint).
    """
    buffered = getattr(pl, "Buffered", None)
    if buffered is not None:
        try:
            return pl.BlockSpec(block_shape, index_map,
                                pipeline_mode=buffered(1))
        except TypeError:
            pass
    return pl.BlockSpec(block_shape, index_map)


# ----------------------------------------------------------------------------
# Fused QKV projection + RoPE kernel (one (batch, row-tile) step per grid pt)
# ----------------------------------------------------------------------------
def _qkv_rope_kernel(x_ref, w_ref, cos_ref, sin_ref, q_ref, k_ref, v_ref, *,
                     n_heads, head_dim, hidden, scale):
    x = x_ref[0]                      # (tm, H)   compute dtype
    w = w_ref[...]                    # (H, 3H)   pre-transposed in the wrapper
    qkv = jnp.dot(x, w, preferred_element_type=jnp.float32)   # (tm, 3H) f32
    cos = cos_ref[...]                # (tm, D/2) f32
    sin = sin_ref[...]                # (tm, D/2) f32

    d2 = head_dim // 2
    # TODO(synk): for very large H, add a 3H-output-chunk grid axis before the
    # resident weight alone exceeds ~half the scoped VMEM limit (v7x).
    for h in range(n_heads):          # static unroll; direct per-head stores
        qb = h * head_dim
        kb = hidden + qb
        q1 = qkv[:, qb:qb + d2]
        q2 = qkv[:, qb + d2:qb + head_dim]
        k1 = qkv[:, kb:kb + d2]
        k2 = qkv[:, kb + d2:kb + head_dim]
        # rotate-half RoPE; wq/wk output rows were deinterleaved per head in
        # the wrapper (QK^T is invariant to that permutation).  The softmax
        # scale 1/sqrt(D) is folded into q once, here.
        q_ref[0, :, qb:qb + d2] = (
            (q1 * cos - q2 * sin) * scale).astype(q_ref.dtype)
        q_ref[0, :, qb + d2:qb + head_dim] = (
            (q1 * sin + q2 * cos) * scale).astype(q_ref.dtype)
        k_ref[0, :, qb:qb + d2] = (k1 * cos - k2 * sin).astype(k_ref.dtype)
        k_ref[0, :, qb + d2:qb + head_dim] = (
            k1 * sin + k2 * cos).astype(k_ref.dtype)
    v_ref[0] = qkv[:, 2 * hidden:].astype(v_ref.dtype)


# ----------------------------------------------------------------------------
# Flash attention kernel: grid (B, q_tiles, max_live_kv_tiles); all heads per
# step; compacted kv schedule (scalar-prefetched) so dead tiles are skipped;
# block-diagonal mask built in-kernel from SMEM segment boundaries.
# ----------------------------------------------------------------------------
def _flash_attn_kernel(sched_ref, cnt_ref, bounds_ref, q_ref, k_ref, v_ref,
                       o_ref, m_sc, l_sc, acc_sc, *, n_heads, head_dim, tq, tk,
                       approx_recip):
    qi = pl.program_id(1)
    j = pl.program_id(2)

    @pl.when(j == 0)
    def _():
        m_sc[...] = jnp.full(m_sc.shape, -jnp.inf, dtype=m_sc.dtype)
        l_sc[...] = jnp.zeros(l_sc.shape, dtype=l_sc.dtype)
        acc_sc[...] = jnp.zeros(acc_sc.shape, dtype=acc_sc.dtype)

    # Compacted schedule: steps j >= live count are padded repeats of the last
    # live kv tile (same block index -> no re-DMA); skip their compute.
    live = j < cnt_ref[qi]

    @pl.when(live)
    def _():
        kvt = sched_ref[qi, j]                  # actual kv-tile index
        # Block-diagonal mask for this (q-tile, kv-tile) pair from the SMEM
        # segment boundaries (no (P, P) bias tensor anywhere).
        q_pos = qi * tq + jax.lax.broadcasted_iota(jnp.int32, (tq, 1), 0)
        k_pos = kvt * tk + jax.lax.broadcasted_iota(jnp.int32, (1, tk), 1)
        seg_q = jnp.zeros((tq, 1), jnp.int32)
        seg_k = jnp.zeros((1, tk), jnp.int32)
        for si in range(bounds_ref.shape[0]):   # static, tiny
            bnd = bounds_ref[si]
            seg_q = seg_q + (q_pos >= bnd).astype(jnp.int32)
            seg_k = seg_k + (k_pos >= bnd).astype(jnp.int32)
        mask = seg_q == seg_k                   # (tq, tk)

        q = q_ref[0]                            # (tq, H) RoPE'd + pre-scaled
        k = k_ref[0]                            # (tk, H)
        v = v_ref[0]                            # (tk, H)

        for h in range(n_heads):                # static unroll
            lo = h * head_dim
            hi = lo + head_dim
            s_h = jax.lax.dot_general(
                q[:, lo:hi], k[:, lo:hi], (((1,), (1,)), ((), ())),
                preferred_element_type=jnp.float32)          # (tq, tk)
            s_h = jnp.where(mask, s_h, NEG_INF)

            # Lane-replicated stats: full-slab loads/stores, narrow math.
            m_prev = m_sc[h]                    # (tq, 128) full vld
            l_prev = l_sc[h]                    # (tq, 128) full vld
            m_prev_c = m_prev[:, :1]            # vreg lane-select, not memory
            l_prev_c = l_prev[:, :1]
            m_cur = jnp.max(s_h, axis=-1, keepdims=True)     # (tq, 1)
            m_new = jnp.maximum(m_prev_c, m_cur)             # (tq, 1)
            alpha = jnp.exp(m_prev_c - m_new)                # (tq, 1) EUP
            p = jnp.exp(s_h - m_new)                         # (tq, tk) EUP
            p = jnp.where(mask, p, 0.0)         # robust for fully-masked rows
            l_new = alpha * l_prev_c + jnp.sum(p, axis=-1, keepdims=True)
            acc_sc[h] = alpha * acc_sc[h] + jnp.dot(
                p.astype(v.dtype), v[:, lo:hi],
                preferred_element_type=jnp.float32)
            m_sc[h] = jnp.broadcast_to(m_new, (tq, STAT_LANES))  # full vst
            l_sc[h] = jnp.broadcast_to(l_new, (tq, STAT_LANES))  # full vst

    @pl.when(j == pl.num_programs(2) - 1)
    def _():
        for h in range(n_heads):
            inv = pl.reciprocal(l_sc[h][:, :1], approx=approx_recip)  # (tq,1)
            o_ref[0, :, h * head_dim:(h + 1) * head_dim] = (
                acc_sc[h] * inv).astype(o_ref.dtype)
    # TODO(synk): if a bundle dump shows exposed K/V DMA after the tile skip,
    # raise pipelining depth on the k/v BlockSpecs (pipeline_mode=Buffered(3)).


# ----------------------------------------------------------------------------
# Tiled output projection kernel (lane-dense (tm, H) blocks; weight (H, H)
# pre-transposed, f32 accumulation, cast on store)
# ----------------------------------------------------------------------------
def _linear_kernel(x_ref, w_ref, o_ref):
    o_ref[0] = jnp.dot(x_ref[0], w_ref[...],
                       preferred_element_type=jnp.float32).astype(o_ref.dtype)


# ----------------------------------------------------------------------------
# Full module forward
# ----------------------------------------------------------------------------
def pixtral_attention_forward(x, wq, wk, wv, wo, freqs_cos, freqs_sin,
                              seqlens, n_heads, *,
                              compute_dtype=jnp.bfloat16,
                              out_dtype=None,
                              tm=None, tq=None, tk=None,
                              vmem_limit_bytes=None):
    B, P, H = x.shape
    assert H % n_heads == 0
    D = H // n_heads
    assert D % 2 == 0
    D2 = D // 2
    scale = 1.0 / math.sqrt(D)
    if out_dtype is None:
        out_dtype = x.dtype

    tm = tm if tm is not None else min(P, 256)
    tq = tq if tq is not None else min(P, 256)
    tk = tk if tk is not None else min(P, 256)
    assert P % tm == 0 and P % tq == 0 and P % tk == 0

    # --- weight prep (one-time; precompute per model in real use) ----------
    # Deinterleave wq/wk output rows per head so RoPE is rotate-half form,
    # then transpose once so the kernels do plain A @ B (no W.T in-kernel).
    perm = np.arange(H).reshape(n_heads, D)
    perm = np.concatenate([perm[:, 0::2], perm[:, 1::2]], axis=1).reshape(-1)
    wqkv_t = jnp.concatenate([wq[perm], wk[perm], wv],
                             axis=0).T.astype(compute_dtype)       # (H, 3H)
    wo_t = wo.T.astype(compute_dtype)                              # (H, H)
    x_c = x.astype(compute_dtype)
    cos = freqs_cos.astype(jnp.float32)
    sin = freqs_sin.astype(jnp.float32)

    # --- block-diagonal structure (host-side; seqlens is static) -----------
    seq = np.asarray(seqlens, dtype=np.int64)
    assert int(seq.sum()) == P, "sum(seqlens) must equal the patch count P"
    cuts = np.cumsum(seq)[:-1]                      # interior boundaries
    bounds_np = cuts.astype(np.int32) if cuts.size else np.array([P], np.int32)
    bounds = jnp.asarray(bounds_np)

    pos = np.arange(P)
    seg = (np.searchsorted(cuts, pos, side="right") if cuts.size
           else np.zeros(P, np.int64))
    n_q, n_k = P // tq, P // tk
    q_lo, q_hi = seg[np.arange(n_q) * tq], seg[np.arange(n_q) * tq + tq - 1]
    k_lo, k_hi = seg[np.arange(n_k) * tk], seg[np.arange(n_k) * tk + tk - 1]
    live = (q_lo[:, None] <= k_hi[None, :]) & (k_lo[None, :] <= q_hi[:, None])
    counts = live.sum(axis=1).astype(np.int32)      # >= 1 for every q tile
    max_live = int(counts.max())
    sched_np = np.zeros((n_q, max_live), np.int32)
    for i in range(n_q):
        idxs = np.nonzero(live[i])[0].astype(np.int32)
        sched_np[i, :idxs.size] = idxs
        sched_np[i, idxs.size:] = idxs[-1]          # pad: repeat -> no re-DMA
    kv_sched = jnp.asarray(sched_np)
    kv_count = jnp.asarray(counts)

    def _cparams(dims):
        kwargs = dict(dimension_semantics=dims)
        if vmem_limit_bytes is not None:
            kwargs["vmem_limit_bytes"] = vmem_limit_bytes
        return pltpu.CompilerParams(**kwargs)

    # ------------------- fused QKV projection + RoPE ------------------------
    qkv_kernel = functools.partial(_qkv_rope_kernel, n_heads=n_heads,
                                   head_dim=D, hidden=H, scale=scale)
    q, k, v = pl.pallas_call(
        qkv_kernel,
        out_shape=[jax.ShapeDtypeStruct((B, P, H), compute_dtype)] * 3,
        grid_spec=pltpu.PrefetchScalarGridSpec(
            num_scalar_prefetch=0,
            grid=(B, P // tm),
            in_specs=[
                pl.BlockSpec((1, tm, H), lambda b, i: (b, i, 0)),
                _resident_spec((H, 3 * H), lambda b, i: (0, 0)),
                pl.BlockSpec((tm, D2), lambda b, i: (i, 0)),
                pl.BlockSpec((tm, D2), lambda b, i: (i, 0)),
            ],
            out_specs=[pl.BlockSpec((1, tm, H), lambda b, i: (b, i, 0))] * 3,
        ),
        compiler_params=_cparams(("parallel", "parallel")),
    )(x_c, wqkv_t, cos, sin)

    # -------- flash attention: compacted kv schedule + in-kernel mask -------
    attn_kernel = functools.partial(
        _flash_attn_kernel, n_heads=n_heads, head_dim=D, tq=tq, tk=tk,
        approx_recip=(compute_dtype != jnp.float32))
    attn = pl.pallas_call(
        attn_kernel,
        out_shape=jax.ShapeDtypeStruct((B, P, H), compute_dtype),
        grid_spec=pltpu.PrefetchScalarGridSpec(
            num_scalar_prefetch=3,
            grid=(B, n_q, max_live),
            in_specs=[
                pl.BlockSpec((1, tq, H),
                             lambda b, i, j, sch, cnt, bnd: (b, i, 0)),
                pl.BlockSpec((1, tk, H),
                             lambda b, i, j, sch, cnt, bnd: (b, sch[i, j], 0)),
                pl.BlockSpec((1, tk, H),
                             lambda b, i, j, sch, cnt, bnd: (b, sch[i, j], 0)),
            ],
            out_specs=pl.BlockSpec((1, tq, H),
                                   lambda b, i, j, sch, cnt, bnd: (b, i, 0)),
            scratch_shapes=[
                pltpu.VMEM((n_heads, tq, STAT_LANES), jnp.float32),  # run max
                pltpu.VMEM((n_heads, tq, STAT_LANES), jnp.float32),  # run den
                pltpu.VMEM((n_heads, tq, D), jnp.float32),           # run acc
            ],
        ),
        compiler_params=_cparams(("parallel", "parallel", "arbitrary")),
    )(kv_sched, kv_count, bounds, q, k, v)

    # ------------------------- output projection ----------------------------
    out = pl.pallas_call(
        _linear_kernel,
        out_shape=jax.ShapeDtypeStruct((B, P, H), out_dtype),
        grid_spec=pltpu.PrefetchScalarGridSpec(
            num_scalar_prefetch=0,
            grid=(B, P // tm),
            in_specs=[
                pl.BlockSpec((1, tm, H), lambda b, i: (b, i, 0)),
                _resident_spec((H, H), lambda b, i: (0, 0)),
            ],
            out_specs=pl.BlockSpec((1, tm, H), lambda b, i: (b, i, 0)),
        ),
        compiler_params=_cparams(("parallel", "parallel")),
    )(attn, wo_t)
    return out


# ----------------------------------------------------------------------------
# Pure-JAX reference (mirrors the PyTorch forward semantics)
# ----------------------------------------------------------------------------
def reference_forward(x, wq, wk, wv, wo, freqs_cos, freqs_sin, seg_ids, n_heads):
    B, P, H = x.shape
    D = H // n_heads
    q = (x @ wq.T).reshape(B, P, n_heads, D)
    k = (x @ wk.T).reshape(B, P, n_heads, D)
    v = (x @ wv.T).reshape(B, P, n_heads, D)

    def rope(t):
        tr = t[..., 0::2]
        ti = t[..., 1::2]
        c = freqs_cos[None, :, None, :]
        s = freqs_sin[None, :, None, :]
        o_r = tr * c - ti * s
        o_i = tr * s + ti * c
        return jnp.stack([o_r, o_i], axis=-1).reshape(B, P, n_heads, D)

    qh = rope(q).transpose(0, 2, 1, 3)
    kh = rope(k).transpose(0, 2, 1, 3)
    vh = v.transpose(0, 2, 1, 3)

    bias = jnp.where(seg_ids[:, None] == seg_ids[None, :], 0.0, -1e30)
    scores = jnp.einsum("bhqd,bhkd->bhqk", qh, kh) / math.sqrt(D)
    scores = scores + bias[None, None]
    p = jax.nn.softmax(scores, axis=-1)
    o = jnp.einsum("bhqk,bhkd->bhqd", p, vh)
    o = o.transpose(0, 2, 1, 3).reshape(B, P, H)
    return o @ wo.T


if __name__ == "__main__":
    # VisionEncoderArgs-like small config:
    #   hidden_size=32, num_attention_heads=4 (head_dim=8), rope_theta=10000
    # Three "images" with uneven sizes so the compacted kv-tile schedule has
    # both skipped (never-visited) tiles and a padded (pl.when-gated) step.
    B, P, H, nH = 2, 48, 32, 4
    D = H // nH
    rope_theta = 10000.0
    seqlens = [16, 24, 8]
    tm = tq = tk = 16

    key = jax.random.PRNGKey(0)
    kx, kq, kk, kv_, ko = jax.random.split(key, 5)
    x = jax.random.normal(kx, (B, P, H), dtype=jnp.float32)
    sw = 1.0 / math.sqrt(H)
    wq = jax.random.normal(kq, (H, H), dtype=jnp.float32) * sw
    wk = jax.random.normal(kk, (H, H), dtype=jnp.float32) * sw
    wv = jax.random.normal(kv_, (H, H), dtype=jnp.float32) * sw
    wo = jax.random.normal(ko, (H, H), dtype=jnp.float32) * sw

    # freqs_cis equivalent: complex64 (patches, head_dim/2) stored as cos/sin
    half = D // 2
    inv_freq = 1.0 / (rope_theta ** (jnp.arange(half, dtype=jnp.float32) * 2.0 / D))
    pos = jnp.arange(P, dtype=jnp.float32)
    angles = pos[:, None] * inv_freq[None, :]
    freqs_cos = jnp.cos(angles)
    freqs_sin = jnp.sin(angles)

    seg_ids = jnp.concatenate([jnp.full((n,), i, dtype=jnp.int32)
                               for i, n in enumerate(seqlens)])
    ref = reference_forward(x, wq, wk, wv, wo, freqs_cos, freqs_sin, seg_ids, nH)

    # f32 compute path: tight correctness check.
    out_f32 = pixtral_attention_forward(
        x, wq, wk, wv, wo, freqs_cos, freqs_sin, seqlens, nH,
        compute_dtype=jnp.float32, tm=tm, tq=tq, tk=tk)
    out_f32 = jax.block_until_ready(out_f32)
    assert out_f32.shape == (B, P, H)
    np.testing.assert_allclose(np.asarray(out_f32), np.asarray(ref),
                               rtol=1e-4, atol=1e-4)

    # bf16 MXU path (default / fast path): looser tolerance.
    out_bf16 = pixtral_attention_forward(
        x, wq, wk, wv, wo, freqs_cos, freqs_sin, seqlens, nH,
        compute_dtype=jnp.bfloat16, tm=tm, tq=tq, tk=tk)
    out_bf16 = jax.block_until_ready(out_bf16)
    np.testing.assert_allclose(np.asarray(out_bf16), np.asarray(ref),
                               rtol=5e-2, atol=5e-2)

    print("KERNEL_OK")
</pallas_src>

<mosaic_0001>
module attributes {stable_mosaic.version = 11 : i64} {
  func.func @_qkv_rope_kernel(%arg0: i32, %arg1: i32, %arg2: memref<1x16x32xf32, #tpu.memory_space<vmem>>, %arg3: memref<32x96xf32, #tpu.memory_space<vmem>>, %arg4: memref<16x4xf32, #tpu.memory_space<vmem>>, %arg5: memref<16x4xf32, #tpu.memory_space<vmem>>, %arg6: memref<1x16x32xf32, #tpu.memory_space<vmem>>, %arg7: memref<1x16x32xf32, #tpu.memory_space<vmem>>, %arg8: memref<1x16x32xf32, #tpu.memory_space<vmem>>) attributes {dimension_semantics = [#tpu.dimension_semantics<parallel>, #tpu.dimension_semantics<parallel>], iteration_bounds = array<i64: 2, 3>, scalar_prefetch = 0 : i64, scratch_operands = 0 : i64, tpu.core_type = #tpu.core_type<tc>, window_params = [{transform_indices = @transform_0, window_bounds = array<i64: 1, 16, 32>}, {pipeline_mode = #tpu.pipeline_mode<synchronous>, transform_indices = @transform_1, window_bounds = array<i64: 32, 96>}, {transform_indices = @transform_2, window_bounds = array<i64: 16, 4>}, {transform_indices = @transform_3, window_bounds = array<i64: 16, 4>}, {transform_indices = @transform_4, window_bounds = array<i64: 1, 16, 32>}, {transform_indices = @transform_5, window_bounds = array<i64: 1, 16, 32>}, {transform_indices = @transform_6, window_bounds = array<i64: 1, 16, 32>}]} {
    %c0 = arith.constant 0 : index
    %c0_0 = arith.constant 0 : index
    %c0_1 = arith.constant 0 : index
    %0 = vector.load %arg2[%c0, %c0_0, %c0_1] : memref<1x16x32xf32, #tpu.memory_space<vmem>>, vector<1x16x32xf32>
    %1 = vector.shape_cast %0 : vector<1x16x32xf32> to vector<16x32xf32>
    %c0_2 = arith.constant 0 : index
    %c0_3 = arith.constant 0 : index
    %2 = vector.load %arg3[%c0_2, %c0_3] : memref<32x96xf32, #tpu.memory_space<vmem>>, vector<32x96xf32>
    %cst = arith.constant dense<0.000000e+00> : vector<16x96xf32>
    %3 = tpu.matmul %1, %2, %cst {dimension_numbers = #tpu.dot_dimension_numbers<[1], [0], [0], [1], [0, 0, 1, 1], [], []>} : vector<16x32xf32>, vector<32x96xf32>, vector<16x96xf32> -> vector<16x96xf32>
    %c0_4 = arith.constant 0 : index
    %c0_5 = arith.constant 0 : index
    %4 = vector.load %arg4[%c0_4, %c0_5] : memref<16x4xf32, #tpu.memory_space<vmem>>, vector<16x4xf32>
    %c0_6 = arith.constant 0 : index
    %c0_7 = arith.constant 0 : index
    %5 = vector.load %arg5[%c0_6, %c0_7] : memref<16x4xf32, #tpu.memory_space<vmem>>, vector<16x4xf32>
    %6 = vector.extract_strided_slice %3 {offsets = [0, 0], sizes = [16, 4], strides = [1, 1]} : vector<16x96xf32> to vector<16x4xf32>
    %7 = vector.extract_strided_slice %3 {offsets = [0, 4], sizes = [16, 4], strides = [1, 1]} : vector<16x96xf32> to vector<16x4xf32>
    %8 = vector.extract_strided_slice %3 {offsets = [0, 32], sizes = [16, 4], strides = [1, 1]} : vector<16x96xf32> to vector<16x4xf32>
    %9 = vector.extract_strided_slice %3 {offsets = [0, 36], sizes = [16, 4], strides = [1, 1]} : vector<16x96xf32> to vector<16x4xf32>
    %10 = arith.mulf %6, %4 : vector<16x4xf32>
    %11 = arith.mulf %7, %5 : vector<16x4xf32>
    %12 = arith.subf %10, %11 : vector<16x4xf32>
    %cst_8 = arith.constant 0.353553385 : f32
    %13 = vector.broadcast %cst_8 : f32 to vector<16x4xf32>
    %14 = arith.mulf %12, %13 : vector<16x4xf32>
    %c0_9 = arith.constant 0 : index
    %c0_10 = arith.constant 0 : index
    %c0_11 = arith.constant 0 : index
    %15 = vector.load %arg6[%c0_9, %c0_10, %c0_11] : memref<1x16x32xf32, #tpu.memory_space<vmem>>, vector<1x16x4xf32>
    %16 = vector.shape_cast %15 : vector<1x16x4xf32> to vector<16x4xf32>
    %17 = vector.shape_cast %14 : vector<16x4xf32> to vector<1x16x4xf32>
    tpu.vector_store %arg6[%c0_9, %c0_10, %c0_11], %17 {strides = array<i32>} : memref<1x16x32xf32, #tpu.memory_space<vmem>>, vector<1x16x4xf32>,
    %18 = arith.mulf %6, %5 : vector<16x4xf32>
    %19 = arith.mulf %7, %4 : vector<16x4xf32>
    %20 = arith.addf %18, %19 : vector<16x4xf32>
    %cst_12 = arith.constant 0.353553385 : f32
    %21 = vector.broadcast %cst_12 : f32 to vector<16x4xf32>
    %22 = arith.mulf %20, %21 : vector<16x4xf32>
    %c0_13 = arith.constant 0 : index
    %c0_14 = arith.constant 0 : index
    %c4 = arith.constant 4 : index
    %23 = vector.load %arg6[%c0_13, %c0_14, %c4] : memref<1x16x32xf32, #tpu.memory_space<vmem>>, vector<1x16x4xf32>
    %24 = vector.shape_cast %23 : vector<1x16x4xf32> to vector<16x4xf32>
    %25 = vector.shape_cast %22 : vector<16x4xf32> to vector<1x16x4xf32>
    tpu.vector_store %arg6[%c0_13, %c0_14, %c4], %25 {strides = array<i32>} : memref<1x16x32xf32, #tpu.memory_space<vmem>>, vector<1x16x4xf32>,
    %26 = arith.mulf %8, %4 : vector<16x4xf32>
    %27 = arith.mulf %9, %5 : vector<16x4xf32>
    %28 = arith.subf %26, %27 : vector<16x4xf32>
    %c0_15 = arith.constant 0 : index
    %c0_16 = arith.constant 0 : index
    %c0_17 = arith.constant 0 : index
    %29 = vector.load %arg7[%c0_15, %c0_16, %c0_17] : memref<1x16x32xf32, #tpu.memory_space<vmem>>, vector<1x16x4xf32>
    %30 = vector.shape_cast %29 : vector<1x16x4xf32> to vector<16x4xf32>
    %31 = vector.shape_cast %28 : vector<16x4xf32> to vector<1x16x4xf32>
    tpu.vector_store %arg7[%c0_15, %c0_16, %c0_17], %31 {strides = array<i32>} : memref<1x16x32xf32, #tpu.memory_space<vmem>>, vector<1x16x4xf32>,
    %32 = arith.mulf %8, %5 : vector<16x4xf32>
    %33 = arith.mulf %9, %4 : vector<16x4xf32>
    %34 = arith.addf %32, %33 : vector<16x4xf32>
    %c0_18 = arith.constant 0 : index
    %c0_19 = arith.constant 0 : index
    %c4_20 = arith.constant 4 : index
    %35 = vector.load %arg7[%c0_18, %c0_19, %c4_20] : memref<1x16x32xf32, #tpu.memory_space<vmem>>, vector<1x16x4xf32>
    %36 = vector.shape_cast %35 : vector<1x16x4xf32> to vector<16x4xf32>
    %37 = vector.shape_cast %34 : vector<16x4xf32> to vector<1x16x4xf32>
    tpu.vector_store %arg7[%c0_18, %c0_19, %c4_20], %37 {strides = array<i32>} : memref<1x16x32xf32, #tpu.memory_space<vmem>>, vector<1x16x4xf32>,
    %38 = vector.extract_strided_slice %3 {offsets = [0, 8], sizes = [16, 4], strides = [1, 1]} : vector<16x96xf32> to vector<16x4xf32>
    %39 = vector.extract_strided_slice %3 {offsets = [0, 12], sizes = [16, 4], strides = [1, 1]} : vector<16x96xf32> to vector<16x4xf32>
    %40 = vector.extract_strided_slice %3 {offsets = [0, 40], sizes = [16, 4], strides = [1, 1]} : vector<16x96xf32> to vector<16x4xf32>
    %41 = vector.extract_strided_slice %3 {offsets = [0, 44], sizes = [16, 4], strides = [1, 1]} : vector<16x96xf32> to vector<16x4xf32>
    %42 = arith.mulf %38, %4 : vector<16x4xf32>
    %43 = arith.mulf %39, %5 : vector<16x4xf32>
    %44 = arith.subf %42, %43 : vector<16x4xf32>
    %cst_21 = arith.constant 0.353553385 : f32
    %45 = vector.broadcast %cst_21 : f32 to vector<16x4xf32>
    %46 = arith.mulf %44, %45 : vector<16x4xf32>
    %c0_22 = arith.constant 0 : index
    %c0_23 = arith.constant 0 : index
    %c8 = arith.constant 8 : index
    %47 = vector.load %arg6[%c0_22, %c0_23, %c8] : memref<1x16x32xf32, #tpu.memory_space<vmem>>, vector<1x16x4xf32>
    %48 = vector.shape_cast %47 : vector<1x16x4xf32> to vector<16x4xf32>
    %49 = vector.shape_cast %46 : vector<16x4xf32> to vector<1x16x4xf32>
    tpu.vector_store %arg6[%c0_22, %c0_23, %c8], %49 {strides = array<i32>} : memref<1x16x32xf32, #tpu.memory_space<vmem>>, vector<1x16x4xf32>,
    %50 = arith.mulf %38, %5 : vector<16x4xf32>
    %51 = arith.mulf %39, %4 : vector<16x4xf32>
    %52 = arith.addf %50, %51 : vector<16x4xf32>
    %cst_24 = arith.constant 0.353553385 : f32
    %53 = vector.broadcast %cst_24 : f32 to vector<16x4xf32>
    %54 = arith.mulf %52, %53 : vector<16x4xf32>
    %c0_25 = arith.constant 0 : index
    %c0_26 = arith.constant 0 : index
    %c12 = arith.constant 12 : index
    %55 = vector.load %arg6[%c0_25, %c0_26, %c12] : memref<1x16x32xf32, #tpu.memory_space<vmem>>, vector<1x16x4xf32>
    %56 = vector.shape_cast %55 : vector<1x16x4xf32> to vector<16x4xf32>
    %57 = vector.shape_cast %54 : vector<16x4xf32> to vector<1x16x4xf32>
    tpu.vector_store %arg6[%c0_25, %c0_26, %c12], %57 {strides = array<i32>} : memref<1x16x32xf32, #tpu.memory_space<vmem>>, vector<1x16x4xf32>,
    %58 = arith.mulf %40, %4 : vector<16x4xf32>
    %59 = arith.mulf %41, %5 : vector<16x4xf32>
    %60 = arith.subf %58, %59 : vector<16x4xf32>
    %c0_27 = arith.constant 0 : index
    %c0_28 = arith.constant 0 : index
    %c8_29 = arith.constant 8 : index
    %61 = vector.load %arg7[%c0_27, %c0_28, %c8_29] : memref<1x16x32xf32, #tpu.memory_space<vmem>>, vector<1x16x4xf32>
    %62 = vector.shape_cast %61 : vector<1x16x4xf32> to vector<16x4xf32>
    %63 = vector.shape_cast %60 : vector<16x4xf32> to vector<1x16x4xf32>
    tpu.vector_store %arg7[%c0_27, %c0_28, %c8_29], %63 {strides = array<i32>} : memref<1x16x32xf32, #tpu.memory_space<vmem>>, vector<1x16x4xf32>,
    %64 = arith.mulf %40, %5 : vector<16x4xf32>
    %65 = arith.mulf %41, %4 : vector<16x4xf32>
    %66 = arith.addf %64, %65 : vector<16x4xf32>
    %c0_30 = arith.constant 0 : index
    %c0_31 = arith.constant 0 : index
    %c12_32 = arith.constant 12 : index
    %67 = vector.load %arg7[%c0_30, %c0_31, %c12_32] : memref<1x16x32xf32, #tpu.memory_space<vmem>>, vector<1x16x4xf32>
    %68 = vector.shape_cast %67 : vector<1x16x4xf32> to vector<16x4xf32>
    %69 = vector.shape_cast %66 : vector<16x4xf32> to vector<1x16x4xf32>
    tpu.vector_store %arg7[%c0_30, %c0_31, %c12_32], %69 {strides = array<i32>} : memref<1x16x32xf32, #tpu.memory_space<vmem>>, vector<1x16x4xf32>,
    %70 = vector.extract_strided_slice %3 {offsets = [0, 16], sizes = [16, 4], strides = [1, 1]} : vector<16x96xf32> to vector<16x4xf32>
    %71 = vector.extract_strided_slice %3 {offsets = [0, 20], sizes = [16, 4], strides = [1, 1]} : vector<16x96xf32> to vector<16x4xf32>
    %72 = vector.extract_strided_slice %3 {offsets = [0, 48], sizes = [16, 4], strides = [1, 1]} : vector<16x96xf32> to vector<16x4xf32>
    %73 = vector.extract_strided_slice %3 {offsets = [0, 52], sizes = [16, 4], strides = [1, 1]} : vector<16x96xf32> to vector<16x4xf32>
    %74 = arith.mulf %70, %4 : vector<16x4xf32>
    %75 = arith.mulf %71, %5 : vector<16x4xf32>
    %76 = arith.subf %74, %75 : vector<16x4xf32>
    %cst_33 = arith.constant 0.353553385 : f32
    %77 = vector.broadcast %cst_33 : f32 to vector<16x4xf32>
    %78 = arith.mulf %76, %77 : vector<16x4xf32>
    %c0_34 = arith.constant 0 : index
    %c0_35 = arith.constant 0 : index
    %c16 = arith.constant 16 : index
    %79 = vector.load %arg6[%c0_34, %c0_35, %c16] : memref<1x16x32xf32, #tpu.memory_space<vmem>>, vector<1x16x4xf32>
    %80 = vector.shape_cast %79 : vector<1x16x4xf32> to vector<16x4xf32>
    %81 = vector.shape_cast %78 : vector<16x4xf32> to vector<1x16x4xf32>
    tpu.vector_store %arg6[%c0_34, %c0_35, %c16], %81 {strides = array<i32>} : memref<1x16x32xf32, #tpu.memory_space<vmem>>, vector<1x16x4xf32>,
    %82 = arith.mulf %70, %5 : vector<16x4xf32>
    %83 = arith.mulf %71, %4 : vector<16x4xf32>
    %84 = arith.addf %82, %83 : vector<16x4xf32>
    %cst_36 = arith.constant 0.353553385 : f32
    %85 = vector.broadcast %cst_36 : f32 to vector<16x4xf32>
    %86 = arith.mulf %84, %85 : vector<16x4xf32>
    %c0_37 = arith.constant 0 : index
    %c0_38 = arith.constant 0 : index
    %c20 = arith.constant 20 : index
    %87 = vector.load %arg6[%c0_37, %c0_38, %c20] : memref<1x16x32xf32, #tpu.memory_space<vmem>>, vector<1x16x4xf32>
    %88 = vector.shape_cast %87 : vector<1x16x4xf32> to vector<16x4xf32>
    %89 = vector.shape_cast %86 : vector<16x4xf32> to vector<1x16x4xf32>
    tpu.vector_store %arg6[%c0_37, %c0_38, %c20], %89 {strides = array<i32>} : memref<1x16x32xf32, #tpu.memory_space<vmem>>, vector<1x16x4xf32>,
    %90 = arith.mulf %72, %4 : vector<16x4xf32>
    %91 = arith.mulf %73, %5 : vector<16x4xf32>
    %92 = arith.subf %90, %91 : vector<16x4xf32>
    %c0_39 = arith.constant 0 : index
    %c0_40 = arith.constant 0 : index
    %c16_41 = arith.constant 16 : index
    %93 = vector.load %arg7[%c0_39, %c0_40, %c16_41] : memref<1x16x32xf32, #tpu.memory_space<vmem>>, vector<1x16x4xf32>
    %94 = vector.shape_cast %93 : vector<1x16x4xf32> to vector<16x4xf32>
    %95 = vector.shape_cast %92 : vector<16x4xf32> to vector<1x16x4xf32>
    tpu.vector_store %arg7[%c0_39, %c0_40, %c16_41], %95 {strides = array<i32>} : memref<1x16x32xf32, #tpu.memory_space<vmem>>, vector<1x16x4xf32>,
    %96 = arith.mulf %72, %5 : vector<16x4xf32>
    %97 = arith.mulf %73, %4 : vector<16x4xf32>
    %98 = arith.addf %96, %97 : vector<16x4xf32>
    %c0_42 = arith.constant 0 : index
    %c0_43 = arith.constant 0 : index
    %c20_44 = arith.constant 20 : index
    %99 = vector.load %arg7[%c0_42, %c0_43, %c20_44] : memref<1x16x32xf32, #tpu.memory_space<vmem>>, vector<1x16x4xf32>
    %100 = vector.shape_cast %99 : vector<1x16x4xf32> to vector<16x4xf32>
    %101 = vector.shape_cast %98 : vector<16x4xf32> to vector<1x16x4xf32>
    tpu.vector_store %arg7[%c0_42, %c0_43, %c20_44], %101 {strides = array<i32>} : memref<1x16x32xf32, #tpu.memory_space<vmem>>, vector<1x16x4xf32>,
    %102 = vector.extract_strided_slice %3 {offsets = [0, 24], sizes = [16, 4], strides = [1, 1]} : vector<16x96xf32> to vector<16x4xf32>
    %103 = vector.extract_strided_slice %3 {offsets = [0, 28], sizes = [16, 4], strides = [1, 1]} : vector<16x96xf32> to vector<16x4xf32>
    %104 = vector.extract_strided_slice %3 {offsets = [0, 56], sizes = [16, 4], strides = [1, 1]} : vector<16x96xf32> to vector<16x4xf32>
    %105 = vector.extract_strided_slice %3 {offsets = [0, 60], sizes = [16, 4], strides = [1, 1]} : vector<16x96xf32> to vector<16x4xf32>
    %106 = arith.mulf %102, %4 : vector<16x4xf32>
    %107 = arith.mulf %103, %5 : vector<16x4xf32>
    %108 = arith.subf %106, %107 : vector<16x4xf32>
    %cst_45 = arith.constant 0.353553385 : f32
    %109 = vector.broadcast %cst_45 : f32 to vector<16x4xf32>
    %110 = arith.mulf %108, %109 : vector<16x4xf32>
    %c0_46 = arith.constant 0 : index
    %c0_47 = arith.constant 0 : index
    %c24 = arith.constant 24 : index
    %111 = vector.load %arg6[%c0_46, %c0_47, %c24] : memref<1x16x32xf32, #tpu.memory_space<vmem>>, vector<1x16x4xf32>
    %112 = vector.shape_cast %111 : vector<1x16x4xf32> to vector<16x4xf32>
    %113 = vector.shape_cast %110 : vector<16x4xf32> to vector<1x16x4xf32>
    tpu.vector_store %arg6[%c0_46, %c0_47, %c24], %113 {strides = array<i32>} : memref<1x16x32xf32, #tpu.memory_space<vmem>>, vector<1x16x4xf32>,
    %114 = arith.mulf %102, %5 : vector<16x4xf32>
    %115 = arith.mulf %103, %4 : vector<16x4xf32>
    %116 = arith.addf %114, %115 : vector<16x4xf32>
    %cst_48 = arith.constant 0.353553385 : f32
    %117 = vector.broadcast %cst_48 : f32 to vector<16x4xf32>
    %118 = arith.mulf %116, %117 : vector<16x4xf32>
    %c0_49 = arith.constant 0 : index
    %c0_50 = arith.constant 0 : index
    %c28 = arith.constant 28 : index
    %119 = vector.load %arg6[%c0_49, %c0_50, %c28] : memref<1x16x32xf32, #tpu.memory_space<vmem>>, vector<1x16x4xf32>
    %120 = vector.shape_cast %119 : vector<1x16x4xf32> to vector<16x4xf32>
    %121 = vector.shape_cast %118 : vector<16x4xf32> to vector<1x16x4xf32>
    tpu.vector_store %arg6[%c0_49, %c0_50, %c28], %121 {strides = array<i32>} : memref<1x16x32xf32, #tpu.memory_space<vmem>>, vector<1x16x4xf32>,
    %122 = arith.mulf %104, %4 : vector<16x4xf32>
    %123 = arith.mulf %105, %5 : vector<16x4xf32>
    %124 = arith.subf %122, %123 : vector<16x4xf32>
    %c0_51 = arith.constant 0 : index
    %c0_52 = arith.constant 0 : index
    %c24_53 = arith.constant 24 : index
    %125 = vector.load %arg7[%c0_51, %c0_52, %c24_53] : memref<1x16x32xf32, #tpu.memory_space<vmem>>, vector<1x16x4xf32>
    %126 = vector.shape_cast %125 : vector<1x16x4xf32> to vector<16x4xf32>
    %127 = vector.shape_cast %124 : vector<16x4xf32> to vector<1x16x4xf32>
    tpu.vector_store %arg7[%c0_51, %c0_52, %c24_53], %127 {strides = array<i32>} : memref<1x16x32xf32, #tpu.memory_space<vmem>>, vector<1x16x4xf32>,
    %128 = arith.mulf %104, %5 : vector<16x4xf32>
    %129 = arith.mulf %105, %4 : vector<16x4xf32>
    %130 = arith.addf %128, %129 : vector<16x4xf32>
    %c0_54 = arith.constant 0 : index
    %c0_55 = arith.constant 0 : index
    %c28_56 = arith.constant 28 : index
    %131 = vector.load %arg7[%c0_54, %c0_55, %c28_56] : memref<1x16x32xf32, #tpu.memory_space<vmem>>, vector<1x16x4xf32>
    %132 = vector.shape_cast %131 : vector<1x16x4xf32> to vector<16x4xf32>
    %133 = vector.shape_cast %130 : vector<16x4xf32> to vector<1x16x4xf32>
    tpu.vector_store %arg7[%c0_54, %c0_55, %c28_56], %133 {strides = array<i32>} : memref<1x16x32xf32, #tpu.memory_space<vmem>>, vector<1x16x4xf32>,
    %134 = vector.extract_strided_slice %3 {offsets = [0, 64], sizes = [16, 32], strides = [1, 1]} : vector<16x96xf32> to vector<16x32xf32>
    %c0_57 = arith.constant 0 : index
    %c0_58 = arith.constant 0 : index
    %c0_59 = arith.constant 0 : index
    %135 = vector.load %arg8[%c0_57, %c0_58, %c0_59] : memref<1x16x32xf32, #tpu.memory_space<vmem>>, vector<1x16x32xf32>
    %136 = vector.shape_cast %135 : vector<1x16x32xf32> to vector<16x32xf32>
    %137 = vector.shape_cast %134 : vector<16x32xf32> to vector<1x16x32xf32>
    tpu.vector_store %arg8[%c0_57, %c0_58, %c0_59], %137 {strides = array<i32>} : memref<1x16x32xf32, #tpu.memory_space<vmem>>, vector<1x16x32xf32>,
    return
  }
  func.func @transform_0(%arg0: i32, %arg1: i32) -> (i32, i32, i32) {
    %c0_i32 = arith.constant 0 : i32
    %c0_i32_0 = arith.constant 0 : i32
    return %arg0, %arg1, %c0_i32 : i32, i32, i32
  }
  func.func @transform_1(%arg0: i32, %arg1: i32) -> (i32, i32) {
    %c0_i32 = arith.constant 0 : i32
    %c0_i32_0 = arith.constant 0 : i32
    %c0_i32_1 = arith.constant 0 : i32
    return %c0_i32, %c0_i32_0 : i32, i32
  }
  func.func @transform_2(%arg0: i32, %arg1: i32) -> (i32, i32) {
    %c0_i32 = arith.constant 0 : i32
    %c0_i32_0 = arith.constant 0 : i32
    return %arg1, %c0_i32 : i32, i32
  }
  func.func @transform_3(%arg0: i32, %arg1: i32) -> (i32, i32) {
    %c0_i32 = arith.constant 0 : i32
    %c0_i32_0 = arith.constant 0 : i32
    return %arg1, %c0_i32 : i32, i32
  }
  func.func @transform_4(%arg0: i32, %arg1: i32) -> (i32, i32, i32) {
    %c0_i32 = arith.constant 0 : i32
    %c0_i32_0 = arith.constant 0 : i32
    return %arg0, %arg1, %c0_i32 : i32, i32, i32
  }
  func.func @transform_5(%arg0: i32, %arg1: i32) -> (i32, i32, i32) {
    %c0_i32 = arith.constant 0 : i32
    %c0_i32_0 = arith.constant 0 : i32
    return %arg0, %arg1, %c0_i32 : i32, i32, i32
  }
  func.func @transform_6(%arg0: i32, %arg1: i32) -> (i32, i32, i32) {
    %c0_i32 = arith.constant 0 : i32
    %c0_i32_0 = arith.constant 0 : i32
    return %arg0, %arg1, %c0_i32 : i32, i32, i32
  }
}

</mosaic_0001>

<bundles_post_ra>
// kernel: tpu_custom_call.1
= control target key start
LH: loop header
LB: loop body
LE: loop exit
PB: predicated region body
PF: predicated region fallthrough
CT: control target
= control target key end

     0   :  { %s1450_s21 = smov 0   ;;  %s1452_s22 = smov 0   ;;  %s1961_s0 = inlined_call_operand.vmem [shape: f32[2,48,32], index: 0, kind: input, shape index: {}]   ;;  %s1962_s1 = inlined_call_operand.vmem [shape: f32[32,96], index: 1, kind: input, shape index: {}]   ;;  %s1963_s2 = inlined_call_operand.vmem [shape: f32[48,4], index: 2, kind: input, shape index: {}]   ;;  %s1964_s3 = inlined_call_operand.vmem [shape: f32[48,4], index: 3, kind: input, shape index: {}]   ;;  %s1965_s4 = inlined_call_operand.vmem [shape: f32[2,48,32], index: 4, kind: output, shape index: {0}]   ;;  %s1966_s5 = inlined_call_operand.vmem [shape: f32[2,48,32], index: 5, kind: output, shape index: {1}]   ;;  %s1967_s6 = inlined_call_operand.vmem [shape: f32[2,48,32], index: 6, kind: output, shape index: {2}]  }
   0x1   :  { %s1454_s23 = smov 0   ;;  %s1456_s24 = smov 0  }
   0x2   :  { %s1458_s25 = smov 0  }
   0x3 LB: > { %s26_s26 = sadd.s32 1, %s1386_s23  ;;  %s29_s27 = sadd.s32 1, %s1390_s24  ;;  %s1394_s25 = sphi %s1458_s25, %s17_s25   ;;  %s1390_s24 = sphi %s1456_s24, %s1971_s24   ;;  %s1386_s23 = sphi %s1454_s23, %s1970_s23   ;;  %s1382_s22 = sphi %s1452_s22, %s1969_s22   ;;  %s1378_s21 = sphi %s1450_s21, %s1968_s21  }
   0x4   : > { %p27_p0 = scmp.ge.s32.totalorder %s26_s26, 3  ;;  %p1262_p1 = scmp.ge.s32.totalorder %s1394_s25, 1 }
   0x5   : > { %p264_p2 = scmp.lt.s32.totalorder %s1394_s25, 7 }
   0x6   : > { %s1973_s26 = smov (%p27_p0, %s26_s26), 0  ;;  %s1975_s27 = smov (!%p27_p0, %s29_s27), %s1390_s24 }
   0x7   : > { %p265_p3 = pnand %p1262_p1, %p264_p2  ;;  %p31_p4 = scmp.ge.s32.totalorder %s1975_s27, 2 }
   0x8   : > { %s1263_s8 = sshll.u32 (!%p265_p3), %s1378_s21, 1  ;;  %p331_p6 = scmp.lt.s32.totalorder (!%p265_p3), %s1382_s22, 1 }
   0x9   : > { %s1977_s27 = smov (%p31_p4, %s1975_s27), 0  ;;  %268 = sbr.rel (%p265_p3) target bundleno = 523 (0x20b), region = 36 }
   0xa   : > { %p333_p5 = scmp.lt.s32.totalorder (!%p265_p3), %s1263_s8, 5  ;;  %s1396_s21 = smov (!%p265_p3), 4  }
   0xb   : > { %s1399_s10 = smov (!%p265_p3), 12   ;;  %s1400_s11 = smov (!%p265_p3), 44  }
   0xc   : > { %s1401_s12 = smov (!%p265_p3), 20   ;;  %s1403_s14 = smov (!%p265_p3), 28  }
   0xd   : > { %s1404_s15 = smov (!%p265_p3), 60   ;;  %s1406_s17 = smov (!%p265_p3), 40  }
   0xe   : > { %v387_v0 = vld [vmem:[%s1962_s1 + $0x18] sm:$0xff]  ;;  %v386_v1 = vld [vmem:[%s1962_s1 + $0x10] sm:$0xff]  ;;  %v385_v2 = vld [vmem:[%s1962_s1 + $0x8] sm:$0xff]  ;;  %s1979_s8 = smov (!%p333_p5, %s1263_s8), 5  ;;  %s1981_s22 = smov (!%p331_p6, %s1382_s22), 1  ;;  %vm388_vm0 = vcmask 261120  }
   0xf   : > { %1285 = vmatprep.subr.mxu0 %v387_v0  ;;  %v384_v3 = vld [vmem:[%s1962_s1] sm:$0xff]  ;;  %s1266_s13 = sshll.u32 %s1979_s8, 3  ;;  %s1296_s20 = smul.u32 6, %s1981_s22  ;;  %vm498_vm1 = vcmask 31744   ;;  %vm533_vm2 = vcmask 64544   ;;  %vm636_vm3 = vcmask 97344  }
  0x10   : > { %1286 = vmatpush3.msra.mxu0 %v387_v0  ;;  %s350_s16 = scalar_lea.vmem %s1964_s3, %s1266_s13  ;;  %s344_s19 = scalar_lea.vmem %s1963_s2, %s1266_s13  ;;  %vm675_vm4 = vcmask 130144   ;;  %vm778_vm5 = vcmask 162944   ;;  %vm817_vm6 = vcmask 195744   ;;  %vm920_vm7 = vcmask 228544  }
  0x11   : > { %1287 = vmatprep.subr.mxu0 %v386_v1  ;;  %v1498_v4 = vld [vmem:[%s350_s16] sm:$0xff]  ;;  %v1500_v5 = vld [vmem:[%s344_s19 + $0x8] sm:$0xff]  ;;  %s336_s28 = sadd.s32 %s1296_s20, %s1979_s8  ;;  %s1397_s22 = smov 32   ;;  %vm959_vm8 = vcmask 261344  }
  0x12   : > { %1288 = vmatpush3.msra.mxu0 %v386_v1  ;;  %478 = vrot.lane.b32.xlu0 %v1498_v4, %s1396_s21  ;;  %v1506_v6 = vld [vmem:[%s350_s16 + $0x8] sm:$0xff]  ;;  %s1508_s29 = sshll.u32 %s336_s28, 3  ;;  %v1518_v9 = vld [vmem:[%s344_s19] sm:$0xff]  ;;  %s1398_s8 = smov 36  }
  0x13   : > { %1289 = vmatprep.subr.mxu0 %v385_v2  ;;  %507 = vrot.lane.b32.xlu1 %v1500_v5, %s1396_s21  ;;  %s338_s9 = scalar_lea.vmem %s1961_s0, %s1508_s29  ;;  %s1402_s13 = smov 52  }
  0x14   : > { %1290 = vmatpush3.msra.mxu0 %v385_v2  ;;  %v382_v7 = vld [vmem:[%s338_s9] sm:$0xff]  ;;  %v383_v8 = vld [vmem:[%s338_s9 + $0x8] sm:$0xff]  ;;  %s1405_s16 = smov 8   ;;  %s1407_s18 = smov 16  }
  0x15   : > { %1291 = vmatprep.subr.mxu0 %v384_v3  ;;  %1293 = vmatprep.mubr.msk.f32.mxu0 %vm388_vm0, %v382_v7  ;;  %s1408_s19 = smov 48   ;;  %s1409_s20 = smov 24  }
  0x16   : > { %1292 = vmatpush3.msra.mxu0 %v384_v3  ;;  %480 = vrot.lane.b32.xlu0 %v1506_v6, %s1396_s21  ;;  %s1410_s28 = smov 56   ;;  %s1411_s30 = smov 124  }
  0x17   : > { %538 = vrot.lane.b32.xlu1 %v1500_v5, %s1397_s22  ;;  %1294 = vmatmul.mubr.msk.f32.vlgmr.msra.gmra.mxu0 %vm388_vm0, %v383_v8 }
  0x1a   : > { %505 = vrot.lane.b32.xlu0 %v1518_v9, %s1396_s21 }
  0x1b   : > { %546 = vrot.lane.b32.xlu1 %v1506_v6, %s1398_s8 }
  0x1e   : > { %536 = vrot.lane.b32.xlu0 %v1518_v9, %s1397_s22 }
  0x1f   : > { %574 = vrot.lane.b32.xlu1 %v1506_v6, %s1397_s22 }
  0x22   : > { %544 = vrot.lane.b32.xlu0 %v1498_v4, %s1398_s8 }
  0x23   : > { %582 = vrot.lane.b32.xlu1 %v1500_v5, %s1398_s8 }
  0x26   : > { %572 = vrot.lane.b32.xlu0 %v1498_v4, %s1397_s22  ;;  %s1741_s22 = scalar_lea.vmem %s1965_s4, %s1508_s29 }
  0x27   : > { %649 = vrot.lane.b32.xlu1 %v1500_v5, %s1399_s10 }
  0x2a   : > { %580 = vrot.lane.b32.xlu0 %v1518_v9, %s1398_s8  ;;  %s1412_s8 = smov 96  }
  0x2b   : > { %688 = vrot.lane.b32.xlu1 %v1506_v6, %s1400_s11 }
  0x2e   : > { %647 = vrot.lane.b32.xlu0 %v1518_v9, %s1399_s10 }
  0x2f   : > { %724 = vrot.lane.b32.xlu1 %v1500_v5, %s1400_s11 }
  0x32   : > { %686 = vrot.lane.b32.xlu0 %v1498_v4, %s1400_s11 }
  0x33   : > { %791 = vrot.lane.b32.xlu1 %v1500_v5, %s1401_s12 }
  0x36   : > { %722 = vrot.lane.b32.xlu0 %v1518_v9, %s1400_s11  ;;  %s1414_s11 = smov 64  }
  0x37   : > { %830 = vrot.lane.b32.xlu1 %v1506_v6, %s1402_s13 }
  0x3a   : > { %789 = vrot.lane.b32.xlu0 %v1518_v9, %s1401_s12 }
  0x3b   : > { %866 = vrot.lane.b32.xlu1 %v1500_v5, %s1402_s13 }
  0x3e   : > { %828 = vrot.lane.b32.xlu0 %v1498_v4, %s1402_s13 }
  0x3f   : > { %933 = vrot.lane.b32.xlu1 %v1500_v5, %s1403_s14 }
  0x42   : > { %864 = vrot.lane.b32.xlu0 %v1518_v9, %s1402_s13 }
  0x43   : > { %972 = vrot.lane.b32.xlu1 %v1506_v6, %s1404_s15 }
  0x46   : > { %931 = vrot.lane.b32.xlu0 %v1518_v9, %s1403_s14 }
  0x47   : > { %1008 = vrot.lane.b32.xlu1 %v1500_v5, %s1404_s15 }
  0x4a   : > { %970 = vrot.lane.b32.xlu0 %v1498_v4, %s1404_s15 }
  0x4b   : > { %610 = vrot.lane.b32.xlu1 %v1500_v5, %s1405_s16 }
  0x4e   : > { %1006 = vrot.lane.b32.xlu0 %v1518_v9, %s1404_s15 }
  0x4f   : > { %618 = vrot.lane.b32.xlu1 %v1506_v6, %s1399_s10 }
  0x52   : > { %608 = vrot.lane.b32.xlu0 %v1518_v9, %s1405_s16 }
  0x53   : > { %641 = vrot.lane.b32.xlu1 %v1506_v6, %s1405_s16 }
  0x56   : > { %616 = vrot.lane.b32.xlu0 %v1498_v4, %s1399_s10  ;;  %s1413_s10 = smov 100  }
  0x57   : > { %680 = vrot.lane.b32.xlu1 %v1500_v5, %s1406_s17 }
  0x5a   : > { %639 = vrot.lane.b32.xlu0 %v1498_v4, %s1405_s16  ;;  %s380_s16 = scalar_lea.vmem %s1967_s6, %s1508_s29 }
  0x5b   : > { %760 = vrot.lane.b32.xlu1 %v1506_v6, %s1401_s12 }
  0x5e   : > { %678 = vrot.lane.b32.xlu0 %v1518_v9, %s1406_s17 }
  0x5f   : > { %716 = vrot.lane.b32.xlu1 %v1506_v6, %s1406_s17 }
  0x62   : > { %758 = vrot.lane.b32.xlu0 %v1498_v4, %s1401_s12 }
  0x63   : > { %783 = vrot.lane.b32.xlu1 %v1506_v6, %s1407_s18 }
  0x66   : > { %714 = vrot.lane.b32.xlu0 %v1498_v4, %s1406_s17 }
  0x67   : > { %822 = vrot.lane.b32.xlu1 %v1500_v5, %s1408_s19 }
  0x6a   : > { %781 = vrot.lane.b32.xlu0 %v1498_v4, %s1407_s18 }
  0x6b   : > { %902 = vrot.lane.b32.xlu1 %v1506_v6, %s1403_s14 }
  0x6e   : > { %820 = vrot.lane.b32.xlu0 %v1518_v9, %s1408_s19 }
  0x6f   : > { %858 = vrot.lane.b32.xlu1 %v1506_v6, %s1408_s19 }
  0x72   : > { %900 = vrot.lane.b32.xlu0 %v1498_v4, %s1403_s14  ;;  %s1862_s14 = scalar_lea.vmem %s1966_s5, %s1508_s29 }
  0x73   : > { %925 = vrot.lane.b32.xlu1 %v1506_v6, %s1409_s20 }
  0x76   : > { %856 = vrot.lane.b32.xlu0 %v1498_v4, %s1408_s19 }
  0x77   : > { %964 = vrot.lane.b32.xlu1 %v1500_v5, %s1410_s28 }
  0x7a   : > { %923 = vrot.lane.b32.xlu0 %v1498_v4, %s1409_s20 }
  0x7b   : > { %1000 = vrot.lane.b32.xlu1 %v1506_v6, %s1410_s28 }
  0x7e   : > { %962 = vrot.lane.b32.xlu0 %v1518_v9, %s1410_s28 }
  0x7f   : > { %752 = vrot.lane.b32.xlu1 %v1500_v5, %s1407_s18 }
  0x82   : > { %998 = vrot.lane.b32.xlu0 %v1498_v4, %s1410_s28 }
  0x83   : > { %894 = vrot.lane.b32.xlu1 %v1500_v5, %s1409_s20 }
  0x84   : > { %v1588_v10 = vpop.permute.xlu0 %478 }
  0x85   : > { %v508_v13 = vpop.permute.xlu1 %507 }
  0x86   : > { %750 = vrot.lane.b32.xlu0 %v1518_v9, %s1407_s18 }
  0x88   : > { %v481_v11 = vpop.permute.xlu0 %480 }
  0x89   : > { %v1594_v15 = vpop.permute.xlu1 %538 }
  0x8a   : > { %892 = vrot.lane.b32.xlu0 %v1518_v9, %s1409_s20 }
  0x8c   : > { %v506_v12 = vpop.permute.xlu0 %505 }
  0x8d   : > { %v547_v17 = vpop.permute.xlu1 %546 }
  0x90   : > { %v1592_v14 = vpop.permute.xlu0 %536 }
  0x91   : > { %v1598_v19 = vpop.permute.xlu1 %574 }
  0x94   : > { %v545_v16 = vpop.permute.xlu0 %544 }
  0x95   : > { %v583_v21 = vpop.permute.xlu1 %582 }
  0x98   : > { %v1596_v18 = vpop.permute.xlu0 %572 }
  0x99   : > { %v650_v23 = vpop.permute.xlu1 %649 }
  0x9c   : > { %v581_v20 = vpop.permute.xlu0 %580 }
  0x9d   : > { %v689_v25 = vpop.permute.xlu1 %688 }
  0xa0   : > { %v648_v22 = vpop.permute.xlu0 %647 }
  0xa1   : > { %v725_v27 = vpop.permute.xlu1 %724 }
  0xa4   : > { %v687_v24 = vpop.permute.xlu0 %686 }
  0xa5   : > { %v792_v29 = vpop.permute.xlu1 %791 }
  0xa8   : > { %v723_v26 = vpop.permute.xlu0 %722 }
  0xa9   : > { %v831_v31 = vpop.permute.xlu1 %830 }
  0xac   : > { %v790_v28 = vpop.permute.xlu0 %789 }
  0xad   : > { %v867_v33 = vpop.permute.xlu1 %866 }
  0xb0   : > { %v829_v30 = vpop.permute.xlu0 %828 }
  0xb1   : > { %v1602_v35 = vpop.permute.xlu1 %933 }
  0xb4   : > { %v865_v32 = vpop.permute.xlu0 %864 }
  0xb5   : > { %v1606_v37 = vpop.permute.xlu1 %972 }
  0xb8   : > { %v1600_v34 = vpop.permute.xlu0 %931 }
  0xb9   : > { %v1617_v43 = vpop.permute.xlu1 %1008 }
  0xbc   : > { %v1604_v36 = vpop.permute.xlu0 %970 }
  0xbd   : > { %v1627_v48 = vpop.permute.xlu1 %610 }
  0xc0   : > { %v1611_v40 = vpop.permute.xlu0 %1006 }
  0xc1   : > { %v619_v53 = vpop.permute.xlu1 %618 }
  0xc4   : > { %v1623_v46 = vpop.permute.xlu0 %608 }
  0xc5   : > { %v1643_v58 = vpop.permute.xlu1 %641 }
  0xc8   : > { %v617_v51 = vpop.permute.xlu0 %616 }
  0xc9   : > { %v1653_v63 = vpop.permute.xlu1 %680 }
  0xcc   : > { %v1639_v56 = vpop.permute.xlu0 %639 }
  0xcd   : > { %v761_v7 = vpop.permute.xlu1 %760 }
  0xd0   : > { %v1649_v61 = vpop.permute.xlu0 %678 }
  0xd4   : > { %v759_v2 = vpop.permute.xlu0 %758 }
  0xd7   : > { %v1608_v38 = vpop.f32.mrf.mxu0 }
  0xd8   : > { %v485_v39 = vmul.f32 %v1608_v38, %v481_v11  ;;  %v512_v44 = vmul.f32 %v1608_v38, %v508_v13  ;;  %v551_v47 = vmul.f32 %v1608_v38, %v547_v17  ;;  %v587_v50 = vmul.f32 %v1608_v38, %v583_v21 }
  0xd9   : > { %v1613_v41 = vpop.f32.mrf.mxu0  ;;  %v623_v54 = vmul.f32 %v1608_v38, %v619_v53  ;;  %v654_v57 = vmul.f32 %v1608_v38, %v650_v23  ;;  %v693_v60 = vmul.f32 %v1608_v38, %v689_v25  ;;  %v729_v0 = vmul.f32 %v1608_v38, %v725_v27 }
  0xda   : > { %490 = vrot.lane.b32.xlu1 %v485_v39, %s1411_s30  ;;  %v511_v42 = vmul.f32 %v506_v12, %v1613_v41  ;;  %v550_v45 = vmul.f32 %v545_v16, %v1613_v41  ;;  %v586_v49 = vmul.f32 %v581_v20, %v1613_v41  ;;  %v622_v52 = vmul.f32 %v617_v51, %v1613_v41  ;;  %v1665_v12 = vpop.permute.xlu0 %714  ;;  %v1669_v16 = vpop.permute.xlu1 %716 }
  0xdb   : > { %v653_v55 = vmul.f32 %v648_v22, %v1613_v41  ;;  %v692_v59 = vmul.f32 %v687_v24, %v1613_v41  ;;  %v728_v62 = vmul.f32 %v723_v26, %v1613_v41  ;;  %v795_v1 = vmul.f32 %v790_v28, %v1613_v41 }
  0xdc   : > { %515 = vrot.lane.b32.xlu0 %v511_v42, %s1411_s30  ;;  %v796_v3 = vmul.f32 %v1608_v38, %v792_v29  ;;  %v834_v8 = vmul.f32 %v829_v30, %v1613_v41  ;;  %v835_v11 = vmul.f32 %v1608_v38, %v831_v31  ;;  %v870_v13 = vmul.f32 %v865_v32, %v1613_v41 }
  0xdd   : > { %v871_v17 = vmul.f32 %v1608_v38, %v867_v33  ;;  %v937_v20 = vmul.f32 %v1600_v34, %v1613_v41  ;;  %v938_v22 = vmul.f32 %v1608_v38, %v1602_v35  ;;  %v976_v24 = vmul.f32 %v1604_v36, %v1613_v41 }
  0xde   : > { %517 = vrot.lane.b32.xlu1 %v512_v44, %s1411_s30  ;;  %v1676_v21 = vpop.permute.xlu0 %781  ;;  %v1681_v23 = vpop.permute.xlu1 %783  ;;  %v977_v25 = vmul.f32 %v1608_v38, %v1606_v37  ;;  %v1012_v27 = vmul.f32 %v1611_v40, %v1613_v41  ;;  %v1013_v29 = vmul.f32 %v1608_v38, %v1617_v43  ;;  %v764_v30 = vmul.f32 %v759_v2, %v1613_v41 }
  0xdf   : > { %v765_v32 = vmul.f32 %v1608_v38, %v761_v7  ;;  %v484_v36 = vmul.f32 %v1588_v10, %v1613_v41 }
  0xe0   : > { %554 = vrot.lane.b32.xlu0 %v550_v45, %s1411_s30 }
  0xe2   : > { %556 = vrot.lane.b32.xlu1 %v551_v47, %s1411_s30  ;;  %v1689_v26 = vpop.permute.xlu0 %820  ;;  %v1694_v28 = vpop.permute.xlu1 %822 }
  0xe4   : > { %590 = vrot.lane.b32.xlu0 %v586_v49, %s1411_s30 }
  0xe6   : > { %592 = vrot.lane.b32.xlu1 %v587_v50, %s1411_s30  ;;  %v901_v31 = vpop.permute.xlu0 %900  ;;  %v903_v33 = vpop.permute.xlu1 %902 }
  0xe7   : > { %v906_v34 = vmul.f32 %v901_v31, %v1613_v41  ;;  %v907_v35 = vmul.f32 %v1608_v38, %v903_v33 }
  0xe8   : > { %626 = vrot.lane.b32.xlu0 %v622_v52, %s1411_s30  ;;  %v475_v52 = vmul.f32 %v1608_v38, %v1500_v5 }
  0xea   : > { %628 = vrot.lane.b32.xlu1 %v623_v54, %s1411_s30  ;;  %v1711_v37 = vpop.permute.xlu1 %858  ;;  %v1713_v39 = vpop.permute.xlu0 %856 }
  0xec   : > { %657 = vrot.lane.b32.xlu0 %v653_v55, %s1411_s30 }
  0xee   : > { %659 = vrot.lane.b32.xlu1 %v654_v57, %s1411_s30  ;;  %v1715_v40 = vpop.permute.xlu1 %925  ;;  %v1717_v42 = vpop.permute.xlu0 %923 }
  0xf0   : > { %696 = vrot.lane.b32.xlu0 %v692_v59, %s1411_s30 }
  0xf2   : > { %698 = vrot.lane.b32.xlu1 %v693_v60, %s1411_s30  ;;  %v1719_v43 = vpop.permute.xlu1 %964  ;;  %v1721_v44 = vpop.permute.xlu0 %962  ;;  %v542_v60 = vmul.f32 %v1592_v14, %v1613_v41  ;;  %v579_v14 = vmul.f32 %v1608_v38, %v1598_v19 }
  0xf4   : > { %732 = vrot.lane.b32.xlu0 %v728_v62, %s1411_s30 }
  0xf6   : > { %734 = vrot.lane.b32.xlu1 %v729_v0, %s1411_s30  ;;  %v1723_v45 = vpop.permute.xlu1 %1000  ;;  %v1725_v47 = vpop.permute.xlu0 %998  ;;  %v543_v0 = vmul.f32 %v1608_v38, %v1594_v15  ;;  %v1762_v15 = vmul.f32 %v1623_v46, %v1613_v41  ;;  %v684_v46 = vmul.f32 %v1649_v61, %v1613_v41 }
  0xf8   : > { %799 = vrot.lane.b32.xlu0 %v795_v1, %s1411_s30 }
  0xfa   : > { %801 = vrot.lane.b32.xlu1 %v796_v3, %s1411_s30  ;;  %v1727_v10 = vpop.permute.xlu1 %752  ;;  %v1729_v49 = vpop.permute.xlu0 %750  ;;  %v578_v3 = vmul.f32 %v1596_v18, %v1613_v41 }
  0xfc   : > { %838 = vrot.lane.b32.xlu0 %v834_v8, %s1411_s30 }
  0xfe   : > { %840 = vrot.lane.b32.xlu1 %v835_v11, %s1411_s30  ;;  %v1731_v50 = vpop.permute.xlu1 %894  ;;  %v1733_v51 = vpop.permute.xlu0 %892 }
 0x100   : > { %874 = vrot.lane.b32.xlu0 %v870_v13, %s1411_s30 }
 0x102   : > { %876 = vrot.lane.b32.xlu1 %v871_v17, %s1411_s30 }
 0x104   : > { %941 = vrot.lane.b32.xlu0 %v937_v20, %s1411_s30  ;;  %v1771_v20 = vmul.f32 %v1608_v38, %v1627_v48  ;;  %v720_v48 = vmul.f32 %v1665_v12, %v1613_v41  ;;  %v826_v12 = vmul.f32 %v1689_v26, %v1613_v41 }
 0x106   : > { %943 = vrot.lane.b32.xlu1 %v938_v22, %s1411_s30 }
 0x108   : > { %980 = vrot.lane.b32.xlu0 %v976_v24, %s1411_s30 }
 0x10a   : > { %982 = vrot.lane.b32.xlu1 %v977_v25, %s1411_s30 }
 0x10c   : > { %1016 = vrot.lane.b32.xlu0 %v1012_v27, %s1411_s30 }
 0x10e   : > { %1018 = vrot.lane.b32.xlu1 %v1013_v29, %s1411_s30 }
 0x110   : > { %768 = vrot.lane.b32.xlu0 %v764_v30, %s1411_s30  ;;  %v685_v30 = vmul.f32 %v1608_v38, %v1653_v63 }
 0x112   : > { %770 = vrot.lane.b32.xlu1 %v765_v32, %s1411_s30 }
 0x114   : > { %910 = vrot.lane.b32.xlu0 %v906_v34, %s1411_s30 }
 0x116   : > { %912 = vrot.lane.b32.xlu1 %v907_v35, %s1411_s30  ;;  %v721_v35 = vmul.f32 %v1608_v38, %v1669_v16  ;;  %v862_v16 = vmul.f32 %v1713_v39, %v1613_v41  ;;  %v968_v39 = vmul.f32 %v1721_v44, %v1613_v41 }
 0x11a   : > { %488 = vrot.lane.b32.xlu1 %v484_v36, %s1411_s30 }
 0x14c   : > { %v491_v53 = vpop.permute.xlu1 %490 }
 0x14d   : > { %v495_v54 = vsub.f32 %v475_v52, %v491_v53 }
 0x14e   : > { %v1743_v55 = vpop.permute.xlu0 %515 }
 0x14f   : > { %v497_v57 = vmul.f32 0.35355338, %v495_v54  ;;  %v827_v54 = vmul.f32 %v1608_v38, %v1694_v28 }
 0x150   : > { %v1745_v59 = vpop.permute.xlu1 %517 }
 0x151   : > { %500 = vst.msk [vmem:[%s1741_s22 + $0x8] sm:$0xff] %vm498_vm1, %v497_v57 }
 0x152   : > { %v555_v5 = vpop.permute.xlu0 %554 }
 0x153   : > { %v560_v62 = vsub.f32 %v542_v60, %v555_v5 }
 0x154   : > { %v557_v1 = vpop.permute.xlu1 %556 }
 0x155   : > { %v561_v2 = vsub.f32 %v543_v0, %v557_v1  ;;  %564 = vrot.lane.b32.xlu0 %v560_v62, %s1412_s8  ;;  %v863_v0 = vmul.f32 %v1608_v38, %v1711_v37 }
 0x156   : > { %v591_v7 = vpop.permute.xlu0 %590 }
 0x157   : > { %v596_v8 = vadd.f32 %v591_v7, %v578_v3  ;;  %566 = vrot.lane.b32.xlu1 %v561_v2, %s1412_s8 }
 0x158   : > { %v593_v11 = vpop.permute.xlu1 %592 }
 0x159   : > { %v597_v13 = vadd.f32 %v593_v11, %v579_v14  ;;  %600 = vrot.lane.b32.xlu0 %v596_v8, %s1413_s10  ;;  %v969_v8 = vmul.f32 %v1608_v38, %v1719_v43  ;;  %v1004_v11 = vmul.f32 %v1725_v47, %v1613_v41  ;;  %v502_v43 = vmul.f32 %v1608_v38, %v1506_v6 }
 0x15a   : > { %v1764_v17 = vpop.permute.xlu0 %626  ;;  %v646_v6 = vmul.f32 %v1608_v38, %v1643_v58  ;;  %v788_v58 = vmul.f32 %v1608_v38, %v1681_v23  ;;  %v474_v23 = vmul.f32 %v1518_v9, %v1613_v41 }
 0x15b   : > { %v632_v18 = vsub.f32 %v1762_v15, %v1764_v17  ;;  %602 = vrot.lane.b32.xlu1 %v597_v13, %s1413_s10  ;;  %v501_v13 = vmul.f32 %v1498_v4, %v1613_v41  ;;  %v522_v47 = vadd.f32 %v1745_v59, %v502_v43  ;;  %v645_v4 = vmul.f32 %v1639_v56, %v1613_v41 }
 0x15c   : > { %v1773_v19 = vpop.permute.xlu1 %628  ;;  %v787_v59 = vmul.f32 %v1676_v21, %v1613_v41  ;;  %v929_v21 = vmul.f32 %v1717_v42, %v1613_v41  ;;  %v899_v15 = vmul.f32 %v1608_v38, %v1731_v50 }
 0x15d   : > { %v633_v22 = vsub.f32 %v1771_v20, %v1773_v19  ;;  %v521_v44 = vadd.f32 %v1743_v55, %v501_v13  ;;  %v524_v56 = vmul.f32 0.35355338, %v522_v47 }
 0x15e   : > { %v658_v24 = vpop.permute.xlu0 %657 }
 0x15f   : > { %v523_v55 = vmul.f32 0.35355338, %v521_v44  ;;  %v634_v44 = vmul.f32 0.35355338, %v632_v18 }
 0x160   : > { %v1777_v25 = vpop.permute.xlu1 %659 }
 0x162   : > { %v697_v27 = vpop.permute.xlu0 %696 }
 0x163   : > { %v702_v29 = vsub.f32 %v684_v46, %v697_v27 }
 0x164   : > { %v699_v31 = vpop.permute.xlu1 %698 }
 0x165   : > { %v703_v32 = vsub.f32 %v685_v30, %v699_v31  ;;  %706 = vrot.lane.b32.xlu0 %v702_v29, %s1412_s8  ;;  %v1005_v29 = vmul.f32 %v1608_v38, %v1723_v45  ;;  %v1824_v45 = vmul.f32 %v1608_v38, %v1727_v10 }
 0x166   : > { %v733_v33 = vpop.permute.xlu0 %732 }
 0x167   : > { %v738_v34 = vadd.f32 %v733_v33, %v720_v48  ;;  %708 = vrot.lane.b32.xlu1 %v703_v32, %s1412_s8  ;;  %v663_v32 = vadd.f32 %v658_v24, %v645_v4 }
 0x168   : > { %v735_v61 = vpop.permute.xlu1 %734 }
 0x169   : > { %v739_v36 = vadd.f32 %v735_v61, %v721_v35  ;;  %742 = vrot.lane.b32.xlu0 %v738_v34, %s1413_s10  ;;  %v664_v34 = vadd.f32 %v1777_v25, %v646_v6  ;;  %v665_v10 = vmul.f32 0.35355338, %v663_v32  ;;  %v930_v25 = vmul.f32 %v1608_v38, %v1715_v40 }
 0x16a   : > { %v800_v52 = vpop.permute.xlu0 %799 }
 0x16b   : > { %744 = vrot.lane.b32.xlu1 %v739_v36, %s1413_s10  ;;  %v805_v24 = vadd.f32 %v800_v52, %v787_v59  ;;  %v666_v36 = vmul.f32 0.35355338, %v664_v34 }
 0x16c   : > { %v802_v63 = vpop.permute.xlu1 %801 }
 0x16e   : > { %v839_v53 = vpop.permute.xlu0 %838 }
 0x16f   : > { %v844_v57 = vsub.f32 %v826_v12, %v839_v53  ;;  %v806_v12 = vadd.f32 %v802_v63, %v788_v58  ;;  %v807_v53 = vmul.f32 0.35355338, %v805_v24 }
 0x170   : > { %v841_v60 = vpop.permute.xlu1 %840 }
 0x171   : > { %v845_v5 = vsub.f32 %v827_v54, %v841_v60  ;;  %848 = vrot.lane.b32.xlu0 %v844_v57, %s1412_s8  ;;  %v808_v57 = vmul.f32 0.35355338, %v806_v12 }
 0x172   : > { %v875_v62 = vpop.permute.xlu0 %874 }
 0x173   : > { %v880_v1 = vadd.f32 %v875_v62, %v862_v16  ;;  %850 = vrot.lane.b32.xlu1 %v845_v5, %s1412_s8 }
 0x174   : > { %v877_v26 = vpop.permute.xlu1 %876 }
 0x175   : > { %v881_v2 = vadd.f32 %v877_v26, %v863_v0  ;;  %884 = vrot.lane.b32.xlu0 %v880_v1, %s1413_s10 }
 0x176   : > { %v942_v28 = vpop.permute.xlu0 %941 }
 0x177   : > { %886 = vrot.lane.b32.xlu1 %v881_v2, %s1413_s10  ;;  %v947_v52 = vadd.f32 %v942_v28, %v929_v21 }
 0x178   : > { %v944_v3 = vpop.permute.xlu1 %943 }
 0x179   : > { %v948_v60 = vadd.f32 %v944_v3, %v930_v25  ;;  %v949_v63 = vmul.f32 0.35355338, %v947_v52 }
 0x17a   : > { %v981_v7 = vpop.permute.xlu0 %980 }
 0x17b   : > { %v986_v14 = vsub.f32 %v968_v39, %v981_v7  ;;  %v950_v5 = vmul.f32 0.35355338, %v948_v60 }
 0x17c   : > { %v983_v37 = vpop.permute.xlu1 %982 }
 0x17d   : > { %v987_v46 = vsub.f32 %v969_v8, %v983_v37  ;;  %990 = vrot.lane.b32.xlu0 %v986_v14, %s1412_s8 }
 0x17e   : > { %v1017_v27 = vpop.permute.xlu0 %1016 }
 0x17f   : > { %v1022_v30 = vadd.f32 %v1017_v27, %v1004_v11  ;;  %992 = vrot.lane.b32.xlu1 %v987_v46, %s1412_s8  ;;  %v756_v27 = vmul.f32 %v1729_v49, %v1613_v41  ;;  %v635_v49 = vmul.f32 0.35355338, %v633_v22 }
 0x180   : > { %v1019_v31 = vpop.permute.xlu1 %1018 }
 0x181   : > { %v1023_v48 = vadd.f32 %v1019_v31, %v1005_v29  ;;  %1026 = vrot.lane.b32.xlu0 %v1022_v30, %s1413_s10  ;;  %v898_v31 = vmul.f32 %v1733_v51, %v1613_v41 }
 0x182   : > { %v769_v9 = vpop.permute.xlu0 %768 }
 0x183   : > { %1028 = vrot.lane.b32.xlu1 %v1023_v48, %s1413_s10  ;;  %v774_v43 = vsub.f32 %v756_v27, %v769_v9 }
 0x184   : > { %v1829_v33 = vpop.permute.xlu1 %770 }
 0x185   : > { %v775_v35 = vsub.f32 %v1824_v45, %v1829_v33  ;;  %527 = vrot.lane.b32.xlu0 %v523_v55, %s1396_s21  ;;  %v776_v17 = vmul.f32 0.35355338, %v774_v43 }
 0x186   : > { %v911_v40 = vpop.permute.xlu0 %910 }
 0x187   : > { %529 = vrot.lane.b32.xlu1 %v524_v56, %s1396_s21  ;;  %v916_v18 = vsub.f32 %v898_v31, %v911_v40  ;;  %v777_v51 = vmul.f32 0.35355338, %v775_v35 }
 0x188   : > { %v1840_v61 = vpop.permute.xlu1 %912 }
 0x189   : > { %669 = vrot.lane.b32.xlu0 %v665_v10, %s1396_s21  ;;  %v917_v20 = vsub.f32 %v899_v15, %v1840_v61  ;;  %v918_v50 = vmul.f32 0.35355338, %v916_v18 }
 0x18b   : > { %671 = vrot.lane.b32.xlu1 %v666_v36, %s1396_s21  ;;  %v919_v22 = vmul.f32 0.35355338, %v917_v20 }
 0x18c   : > { %v489_v54 = vpop.permute.xlu1 %488 }
 0x18d   : > { %v494_v42 = vsub.f32 %v474_v23, %v489_v54  ;;  %811 = vrot.lane.b32.xlu0 %v807_v53, %s1396_s21 }
 0x18f   : > { %v496_v16 = vmul.f32 0.35355338, %v494_v42  ;;  %813 = vrot.lane.b32.xlu1 %v808_v57, %s1396_s21 }
 0x191   : > { %499 = vst.msk [vmem:[%s1741_s22] sm:$0xff] %vm498_vm1, %v496_v16  ;;  %953 = vrot.lane.b32.xlu0 %v949_v63, %s1396_s21 }
 0x193   : > { %955 = vrot.lane.b32.xlu1 %v950_v5, %s1396_s21 }
 0x195   : > { %1036 = vrot.lane.b32.xlu0 %v1613_v41, %s1414_s11 }
 0x197   : > { %1038 = vrot.lane.b32.xlu1 %v1608_v38, %s1414_s11 }
 0x1c7   : > { %v565_v62 = vpop.permute.xlu0 %564 }
 0x1c8   : > { %570 = vst.msk [vmem:[%s1862_s14] sm:$0xff] %vm498_vm1, %v565_v62 }
 0x1c9   : > { %v567_v0 = vpop.permute.xlu1 %566 }
 0x1ca   : > { %571 = vst.msk [vmem:[%s1862_s14 + $0x8] sm:$0xff] %vm498_vm1, %v567_v0 }
 0x1cb   : > { %v601_v1 = vpop.permute.xlu0 %600 }
 0x1cc   : > { %606 = vst.msk [vmem:[%s1862_s14] sm:$0xff] %vm533_vm2, %v601_v1 }
 0x1cd   : > { %v603_v26 = vpop.permute.xlu1 %602 }
 0x1ce   : > { %607 = vst.msk [vmem:[%s1862_s14 + $0x8] sm:$0xff] %vm533_vm2, %v603_v26 }
 0x1d7   : > { %v707_v2 = vpop.permute.xlu0 %706 }
 0x1d8   : > { %712 = vst.msk [vmem:[%s1862_s14] sm:$0xff] %vm636_vm3, %v707_v2 }
 0x1d9   : > { %v709_v28 = vpop.permute.xlu1 %708 }
 0x1da   : > { %713 = vst.msk [vmem:[%s1862_s14 + $0x8] sm:$0xff] %vm636_vm3, %v709_v28 }
 0x1db   : > { %v743_v3 = vpop.permute.xlu0 %742 }
 0x1dc   : > { %748 = vst.msk [vmem:[%s1862_s14] sm:$0xff] %vm675_vm4, %v743_v3 }
 0x1dd   : > { %v745_v39 = vpop.permute.xlu1 %744 }
 0x1de   : > { %749 = vst.msk [vmem:[%s1862_s14 + $0x8] sm:$0xff] %vm675_vm4, %v745_v39 }
 0x1e3   : > { %v849_v7 = vpop.permute.xlu0 %848 }
 0x1e4   : > { %854 = vst.msk [vmem:[%s1862_s14] sm:$0xff] %vm778_vm5, %v849_v7 }
 0x1e5   : > { %v851_v8 = vpop.permute.xlu1 %850 }
 0x1e6   : > { %855 = vst.msk [vmem:[%s1862_s14 + $0x8] sm:$0xff] %vm778_vm5, %v851_v8 }
 0x1e7   : > { %v885_v14 = vpop.permute.xlu0 %884 }
 0x1e8   : > { %890 = vst.msk [vmem:[%s1862_s14] sm:$0xff] %vm817_vm6, %v885_v14 }
 0x1e9   : > { %v887_v37 = vpop.permute.xlu1 %886 }
 0x1ea   : > { %891 = vst.msk [vmem:[%s1862_s14 + $0x8] sm:$0xff] %vm817_vm6, %v887_v37 }
 0x1ef   : > { %v991_v11 = vpop.permute.xlu0 %990 }
 0x1f0   : > { %996 = vst.msk [vmem:[%s1862_s14] sm:$0xff] %vm920_vm7, %v991_v11 }
 0x1f1   : > { %v993_v13 = vpop.permute.xlu1 %992 }
 0x1f2   : > { %997 = vst.msk [vmem:[%s1862_s14 + $0x8] sm:$0xff] %vm920_vm7, %v993_v13 }
 0x1f3   : > { %v1027_v46 = vpop.permute.xlu0 %1026 }
 0x1f4   : > { %1032 = vst.msk [vmem:[%s1862_s14] sm:$0xff] %vm959_vm8, %v1027_v46 }
 0x1f5   : > { %v1029_v29 = vpop.permute.xlu1 %1028 }
 0x1f6   : > { %1033 = vst.msk [vmem:[%s1862_s14 + $0x8] sm:$0xff] %vm959_vm8, %v1029_v29 }
 0x1f7   : > { %v528_v30 = vpop.permute.xlu0 %527 }
 0x1f8   : > { %534 = vst.msk [vmem:[%s1741_s22] sm:$0xff] %vm533_vm2, %v528_v30 }
 0x1f9   : > { %637 = vst.msk [vmem:[%s1741_s22] sm:$0xff] %vm636_vm3, %v634_v44  ;;  %v530_v47 = vpop.permute.xlu1 %529 }
 0x1fa   : > { %535 = vst.msk [vmem:[%s1741_s22 + $0x8] sm:$0xff] %vm533_vm2, %v530_v47 }
 0x1fb   : > { %638 = vst.msk [vmem:[%s1741_s22 + $0x8] sm:$0xff] %vm636_vm3, %v635_v49  ;;  %v670_v41 = vpop.permute.xlu0 %669 }
 0x1fc   : > { %676 = vst.msk [vmem:[%s1741_s22] sm:$0xff] %vm675_vm4, %v670_v41 }
 0x1fd   : > { %779 = vst.msk [vmem:[%s1741_s22] sm:$0xff] %vm778_vm5, %v776_v17  ;;  %v672_v38 = vpop.permute.xlu1 %671 }
 0x1fe   : > { %677 = vst.msk [vmem:[%s1741_s22 + $0x8] sm:$0xff] %vm675_vm4, %v672_v38 }
 0x1ff   : > { %780 = vst.msk [vmem:[%s1741_s22 + $0x8] sm:$0xff] %vm778_vm5, %v777_v51  ;;  %v812_v19 = vpop.permute.xlu0 %811 }
 0x200   : > { %818 = vst.msk [vmem:[%s1741_s22] sm:$0xff] %vm817_vm6, %v812_v19 }
 0x201   : > { %921 = vst.msk [vmem:[%s1741_s22] sm:$0xff] %vm920_vm7, %v918_v50  ;;  %v814_v4 = vpop.permute.xlu1 %813 }
 0x202   : > { %819 = vst.msk [vmem:[%s1741_s22 + $0x8] sm:$0xff] %vm817_vm6, %v814_v4 }
 0x203   : > { %922 = vst.msk [vmem:[%s1741_s22 + $0x8] sm:$0xff] %vm920_vm7, %v919_v22  ;;  %v954_v48 = vpop.permute.xlu0 %953 }
 0x204   : > { %960 = vst.msk [vmem:[%s1741_s22] sm:$0xff] %vm959_vm8, %v954_v48 }
 0x205   : > { %v956_v45 = vpop.permute.xlu1 %955 }
 0x206   : > { %961 = vst.msk [vmem:[%s1741_s22 + $0x8] sm:$0xff] %vm959_vm8, %v956_v45 }
 0x207   : > { %v1037_v55 = vpop.permute.xlu0 %1036 }
 0x208   : > { %1042 = vst.msk [vmem:[%s380_s16] sm:$0xff] %vm388_vm0, %v1037_v55 }
 0x209   : > { %v1039_v32 = vpop.permute.xlu1 %1038 }
 0x20a   : > { %1043 = vst.msk [vmem:[%s380_s16 + $0x8] sm:$0xff] %vm388_vm0, %v1039_v32 }
 0x20b PF: > { %s17_s25 = sadd.s32 1, %s1394_s25   ;;  %s1968_s21 = smov %s1386_s23 }
 0x20c   : > { %p14_p7 = scmp.ge.s32.totalorder %s17_s25, 8   ;;  %s1969_s22 = smov %s1390_s24 }
 0x20d   : > { %s1970_s23 = smov %s1973_s26  ;;  %s1971_s24 = smov %s1977_s27 }
 0x20e   :  { %16 = sbr.rel (!%p14_p7) target bundleno = 3 (0x3), region = 96 }

</bundles_post_ra>
